<compile_context>
chip_gen: v7x
topology: tpu7x:2x2x1
jax: 0.10.0
libtpu: 0.0.40
codegen_flags: <defaults>
</compile_context>

<pallas_src>
import functools

import jax
import jax.numpy as jnp
from jax.experimental import pallas as pl
from jax.experimental.pallas import tpu as pltpu


def _round_up(v, m):
    return (v + m - 1) // m * m


def _pad2(a, shape):
    a = a.reshape((-1, a.shape[-1])) if a.ndim == 2 else a.reshape(1, -1)
    return jnp.pad(a, ((0, shape[0] - a.shape[0]), (0, shape[1] - a.shape[1])))


def _global_sa_kernel(seg_ref,                       # [B+1] int32, SMEM (prefetch)
                      x_ref, pos_ref,                # [tile_n, C_in], [tile_n, 3] bf16
                      w1x_ref, w1p_ref, b1_ref,
                      w2_ref, b2_ref, w3_ref, b3_ref,
                      out_ref,                       # [1, B, C_pad] f32 accumulator
                      *, tile_n, num_batches, tiles_per_split):
    c = pl.program_id(0)      # parallel split (megacore / v7x 2-TC)
    k = pl.program_id(1)      # reduction over point tiles

    @pl.when(k == 0)
    def _():
        out_ref[...] = jnp.full(out_ref.shape, -jnp.inf, out_ref.dtype)

    # --- MLP (Lin + ReLU) x3; first layer split avoids the lane-axis concat ---
    h = (jnp.dot(x_ref[...], w1x_ref[...], preferred_element_type=jnp.float32)
         + jnp.dot(pos_ref[...], w1p_ref[...], preferred_element_type=jnp.float32)
         + b1_ref[...])
    h = jnp.maximum(h, 0.0)
    h = jnp.dot(h.astype(w2_ref.dtype), w2_ref[...],
                preferred_element_type=jnp.float32) + b2_ref[...]
    h = jnp.maximum(h, 0.0)
    h = jnp.dot(h.astype(w3_ref.dtype), w3_ref[...],
                preferred_element_type=jnp.float32) + b3_ref[...]
    h = jnp.maximum(h, 0.0)                                   # [tile_n, C_pad] f32

    # --- sorted-segment running max over this tile ---
    row0 = (c * tiles_per_split + k) * tile_n
    rows = row0 + jax.lax.broadcasted_iota(jnp.int32, (tile_n, 1), 0)

    # TODO(synk): for large B, only the (few) segments overlapping this tile
    #             need processing; B is small for GlobalSAModule so a static
    #             loop over all segments is kept.
    parts = []
    for b in range(num_batches):                               # static & small
        lo = seg_ref[b]
        hi = seg_ref[b + 1]
        mask = (rows >= lo) & (rows < hi)                      # [tile_n, 1]
        parts.append(jnp.max(jnp.where(mask, h, -jnp.inf),
                             axis=0, keepdims=True))           # [1, C_pad]
    tile_max = jnp.concatenate(parts, axis=0)[None]            # [1, B, C_pad]
    out_ref[...] = jnp.maximum(out_ref[...], tile_max)


def global_sa_module(x, pos, batch, params, num_batches, *,
                     tile_n=512, num_splits=2):
    """GlobalSAModule forward. `batch` must be sorted (as in PyTorch Geometric).

    Returns (x_out [B, C_out], pos_out [B, 3] zeros, batch_out [B] arange)."""
    n, c_in = x.shape
    w1, b1, w2, b2, w3, b3 = params
    h1, h2, c_out = w1.shape[1], w2.shape[1], w3.shape[1]
    assert w1.shape[0] == c_in + 3

    # --- lane-pad hidden/output dims to multiples of 128, split W1, cast bf16 ---
    h1p, h2p, cp = _round_up(h1, 128), _round_up(h2, 128), _round_up(c_out, 128)
    w1x = _pad2(w1[:c_in], (c_in, h1p)).astype(jnp.bfloat16)
    w1p = _pad2(w1[c_in:], (3, h1p)).astype(jnp.bfloat16)
    b1p = _pad2(b1, (1, h1p)).astype(jnp.float32)
    w2p = _pad2(w2, (h1p, h2p)).astype(jnp.bfloat16)
    b2p = _pad2(b2, (1, h2p)).astype(jnp.float32)
    w3p = _pad2(w3, (h2p, cp)).astype(jnp.bfloat16)
    b3p = _pad2(b3, (1, cp)).astype(jnp.float32)

    # --- tile sizing: multiple of 8 sublanes, bounded VMEM regardless of N ---
    tile_n = max(8, min(tile_n, _round_up(pl.cdiv(n, num_splits), 8)))
    n_pad = _round_up(n, num_splits * tile_n)
    tiles_per_split = n_pad // (num_splits * tile_n)

    x_p = jnp.zeros((n_pad, c_in), jnp.bfloat16).at[:n].set(x.astype(jnp.bfloat16))
    pos_p = jnp.zeros((n_pad, 3), jnp.bfloat16).at[:n].set(pos.astype(jnp.bfloat16))

    # segment offsets (B+1 scalars -> SMEM via scalar prefetch); padded rows
    # have index >= N so they fall outside every segment automatically.
    seg_starts = jnp.searchsorted(
        batch.astype(jnp.int32),
        jnp.arange(num_batches + 1, dtype=jnp.int32), side="left").astype(jnp.int32)

    def pt_spec(cols):
        return pl.BlockSpec((tile_n, cols),
                            lambda c, k, seg: (c * tiles_per_split + k, 0))

    def resident(shape):      # weights/biases: DMA'd once, stay VMEM-resident
        return pl.BlockSpec(shape, lambda c, k, seg: tuple(0 for _ in shape))

    grid_spec = pltpu.PrefetchScalarGridSpec(
        num_scalar_prefetch=1,
        grid=(num_splits, tiles_per_split),
        in_specs=[
            pt_spec(c_in), pt_spec(3),
            resident(w1x.shape), resident(w1p.shape), resident(b1p.shape),
            resident(w2p.shape), resident(b2p.shape),
            resident(w3p.shape), resident(b3p.shape),
        ],
        out_specs=pl.BlockSpec((1, num_batches, cp), lambda c, k, seg: (c, 0, 0)),
    )

    kernel = functools.partial(
        _global_sa_kernel,
        tile_n=tile_n, num_batches=num_batches, tiles_per_split=tiles_per_split)

    partial_max = pl.pallas_call(
        kernel,
        out_shape=jax.ShapeDtypeStruct((num_splits, num_batches, cp), jnp.float32),
        grid_spec=grid_spec,
        compiler_params=pltpu.CompilerParams(
            dimension_semantics=("parallel", "arbitrary"),
            vmem_limit_bytes=32 * 1024 * 1024),
    )(seg_starts, x_p, pos_p, w1x, w1p, b1p, w2p, b2p, w3p, b3p)

    pooled = jnp.max(partial_max, axis=0)[:, :c_out]           # combine TC partials
    # TODO(synk): empty-segment fill differs across torch_geometric versions;
    #             we use 0.0 (scatter-max with zero fill).
    pooled = jnp.where(jnp.isneginf(pooled), 0.0, pooled)

    pos_out = jnp.zeros((num_batches, 3), dtype=pos.dtype)
    batch_out = jnp.arange(num_batches, dtype=jnp.int32)
    return pooled, pos_out, batch_out


def init_params(key, c_in, h1, h2, c_out):
    k1, k2, k3 = jax.random.split(key, 3)
    def lin(k, fan_in, fan_out):
        w = jax.random.normal(k, (fan_in, fan_out), jnp.float32) * (1.0 / jnp.sqrt(fan_in))
        b = jnp.zeros((1, fan_out), jnp.float32)
        return w, b
    w1, b1 = lin(k1, c_in + 3, h1)
    w2, b2 = lin(k2, h1, h2)
    w3, b3 = lin(k3, h2, c_out)
    return (w1, b1, w2, b2, w3, b3)


def _reference(x, pos, batch, params, num_batches):
    w1, b1, w2, b2, w3, b3 = params
    feat = jnp.concatenate([x, pos], axis=1)
    h = jnp.maximum(feat @ w1 + b1, 0.0)
    h = jnp.maximum(h @ w2 + b2, 0.0)
    h = jnp.maximum(h @ w3 + b3, 0.0)
    out = jnp.full((num_batches, h.shape[1]), -jnp.inf, jnp.float32)
    out = out.at[batch].max(h)
    return jnp.where(jnp.isneginf(out), 0.0, out)


if __name__ == "__main__":
    key = jax.random.PRNGKey(0)
    kx, kp, kw = jax.random.split(key, 3)

    # small shapes: N = 16 points, B = 2 graphs (8 each), C_in = 4
    N, B, C_IN = 16, 2, 4
    H1, H2, C_OUT = 32, 32, 64

    x = jax.random.normal(kx, (N, C_IN), jnp.float32)
    pos = jax.random.normal(kp, (N, 3), jnp.float32)
    batch = jnp.repeat(jnp.arange(B, dtype=jnp.int32), N // B)   # sorted, as in PyG

    params = init_params(kw, C_IN, H1, H2, C_OUT)

    x_out, pos_out, batch_out = global_sa_module(x, pos, batch, params, num_batches=B)
    jax.block_until_ready((x_out, pos_out, batch_out))

    assert x_out.shape == (B, C_OUT)
    assert pos_out.shape == (B, 3)
    assert batch_out.shape == (B,)

    ref = _reference(x, pos, batch, params, B)
    err = float(jnp.max(jnp.abs(x_out - ref)))
    assert err < 0.15, f"max abs error vs reference too large: {err}"

    print("KERNEL_OK")
</pallas_src>

<mosaic_0001>
module attributes {stable_mosaic.version = 11 : i64} {
  func.func @_global_sa_kernel(%arg0: i32, %arg1: i32, %arg2: memref<3xi32, #tpu.memory_space<smem>>, %arg3: memref<8x4xbf16, #tpu.memory_space<vmem>>, %arg4: memref<8x3xbf16, #tpu.memory_space<vmem>>, %arg5: memref<4x128xbf16, #tpu.memory_space<vmem>>, %arg6: memref<3x128xbf16, #tpu.memory_space<vmem>>, %arg7: memref<1x128xf32, #tpu.memory_space<vmem>>, %arg8: memref<128x128xbf16, #tpu.memory_space<vmem>>, %arg9: memref<1x128xf32, #tpu.memory_space<vmem>>, %arg10: memref<128x128xbf16, #tpu.memory_space<vmem>>, %arg11: memref<1x128xf32, #tpu.memory_space<vmem>>, %arg12: memref<1x2x128xf32, #tpu.memory_space<vmem>>) attributes {dimension_semantics = [#tpu.dimension_semantics<parallel>, #tpu.dimension_semantics<arbitrary>], iteration_bounds = array<i64: 2, 1>, scalar_prefetch = 1 : i64, scratch_operands = 0 : i64, tpu.core_type = #tpu.core_type<tc>, window_params = [{transform_indices = @transform_0, window_bounds = array<i64: 8, 4>}, {transform_indices = @transform_1, window_bounds = array<i64: 8, 3>}, {pipeline_mode = #tpu.pipeline_mode<synchronous>, transform_indices = @transform_2, window_bounds = array<i64: 4, 128>}, {pipeline_mode = #tpu.pipeline_mode<synchronous>, transform_indices = @transform_3, window_bounds = array<i64: 3, 128>}, {pipeline_mode = #tpu.pipeline_mode<synchronous>, transform_indices = @transform_4, window_bounds = array<i64: 1, 128>}, {pipeline_mode = #tpu.pipeline_mode<synchronous>, transform_indices = @transform_5, window_bounds = array<i64: 128, 128>}, {pipeline_mode = #tpu.pipeline_mode<synchronous>, transform_indices = @transform_6, window_bounds = array<i64: 1, 128>}, {pipeline_mode = #tpu.pipeline_mode<synchronous>, transform_indices = @transform_7, window_bounds = array<i64: 128, 128>}, {pipeline_mode = #tpu.pipeline_mode<synchronous>, transform_indices = @transform_8, window_bounds = array<i64: 1, 128>}, {transform_indices = @transform_9, window_bounds = array<i64: 1, 2, 128>}]} {
    %c0_i32 = arith.constant 0 : i32
    %0 = arith.cmpi eq, %arg1, %c0_i32 : i32
    %1 = arith.extui %0 : i1 to i32
    %c0_i32_0 = arith.constant 0 : i32
    %2 = arith.cmpi ne, %1, %c0_i32_0 : i32
    scf.if %2 {
      %cst_36 = arith.constant 0xFF800000 : f32
      %68 = vector.broadcast %cst_36 : f32 to vector<1x2x128xf32>
      %c0_37 = arith.constant 0 : index
      %c0_38 = arith.constant 0 : index
      %c0_39 = arith.constant 0 : index
      %69 = vector.load %arg12[%c0_37, %c0_38, %c0_39] : memref<1x2x128xf32, #tpu.memory_space<vmem>>, vector<1x2x128xf32>
      tpu.vector_store %arg12[%c0_37, %c0_38, %c0_39], %68 {strides = array<i32>} : memref<1x2x128xf32, #tpu.memory_space<vmem>>, vector<1x2x128xf32>,
    } else {
    }
    %c0 = arith.constant 0 : index
    %c0_1 = arith.constant 0 : index
    %3 = vector.load %arg3[%c0, %c0_1] : memref<8x4xbf16, #tpu.memory_space<vmem>>, vector<8x4xbf16>
    %c0_2 = arith.constant 0 : index
    %c0_3 = arith.constant 0 : index
    %4 = vector.load %arg5[%c0_2, %c0_3] : memref<4x128xbf16, #tpu.memory_space<vmem>>, vector<4x128xbf16>
    %cst = arith.constant dense<0.000000e+00> : vector<8x128xf32>
    %5 = tpu.matmul %3, %4, %cst {dimension_numbers = #tpu.dot_dimension_numbers<[1], [0], [0], [1], [0, 0, 1, 1], [], []>} : vector<8x4xbf16>, vector<4x128xbf16>, vector<8x128xf32> -> vector<8x128xf32>
    %c0_4 = arith.constant 0 : index
    %c0_5 = arith.constant 0 : index
    %6 = vector.load %arg4[%c0_4, %c0_5] : memref<8x3xbf16, #tpu.memory_space<vmem>>, vector<8x3xbf16>
    %c0_6 = arith.constant 0 : index
    %c0_7 = arith.constant 0 : index
    %7 = vector.load %arg6[%c0_6, %c0_7] : memref<3x128xbf16, #tpu.memory_space<vmem>>, vector<3x128xbf16>
    %cst_8 = arith.constant dense<0.000000e+00> : vector<8x128xf32>
    %8 = tpu.matmul %6, %7, %cst_8 {dimension_numbers = #tpu.dot_dimension_numbers<[1], [0], [0], [1], [0, 0, 1, 1], [], []>} : vector<8x3xbf16>, vector<3x128xbf16>, vector<8x128xf32> -> vector<8x128xf32>
    %9 = arith.addf %5, %8 : vector<8x128xf32>
    %c0_9 = arith.constant 0 : index
    %c0_10 = arith.constant 0 : index
    %10 = vector.load %arg7[%c0_9, %c0_10] : memref<1x128xf32, #tpu.memory_space<vmem>>, vector<1x128xf32>
    %11 = vector.broadcast %10 : vector<1x128xf32> to vector<8x128xf32>
    %12 = arith.addf %9, %11 : vector<8x128xf32>
    %cst_11 = arith.constant 0.000000e+00 : f32
    %13 = vector.broadcast %cst_11 : f32 to vector<8x128xf32>
    %14 = arith.maximumf %12, %13 : vector<8x128xf32>
    %15 = arith.truncf %14 : vector<8x128xf32> to vector<8x128xbf16>
    %c0_12 = arith.constant 0 : index
    %c0_13 = arith.constant 0 : index
    %16 = vector.load %arg8[%c0_12, %c0_13] : memref<128x128xbf16, #tpu.memory_space<vmem>>, vector<128x128xbf16>
    %cst_14 = arith.constant dense<0.000000e+00> : vector<8x128xf32>
    %17 = tpu.matmul %15, %16, %cst_14 {dimension_numbers = #tpu.dot_dimension_numbers<[1], [0], [0], [1], [0, 0, 1, 1], [], []>} : vector<8x128xbf16>, vector<128x128xbf16>, vector<8x128xf32> -> vector<8x128xf32>
    %c0_15 = arith.constant 0 : index
    %c0_16 = arith.constant 0 : index
    %18 = vector.load %arg9[%c0_15, %c0_16] : memref<1x128xf32, #tpu.memory_space<vmem>>, vector<1x128xf32>
    %19 = vector.broadcast %18 : vector<1x128xf32> to vector<8x128xf32>
    %20 = arith.addf %17, %19 : vector<8x128xf32>
    %cst_17 = arith.constant 0.000000e+00 : f32
    %21 = vector.broadcast %cst_17 : f32 to vector<8x128xf32>
    %22 = arith.maximumf %20, %21 : vector<8x128xf32>
    %23 = arith.truncf %22 : vector<8x128xf32> to vector<8x128xbf16>
    %c0_18 = arith.constant 0 : index
    %c0_19 = arith.constant 0 : index
    %24 = vector.load %arg10[%c0_18, %c0_19] : memref<128x128xbf16, #tpu.memory_space<vmem>>, vector<128x128xbf16>
    %cst_20 = arith.constant dense<0.000000e+00> : vector<8x128xf32>
    %25 = tpu.matmul %23, %24, %cst_20 {dimension_numbers = #tpu.dot_dimension_numbers<[1], [0], [0], [1], [0, 0, 1, 1], [], []>} : vector<8x128xbf16>, vector<128x128xbf16>, vector<8x128xf32> -> vector<8x128xf32>
    %c0_21 = arith.constant 0 : index
    %c0_22 = arith.constant 0 : index
    %26 = vector.load %arg11[%c0_21, %c0_22] : memref<1x128xf32, #tpu.memory_space<vmem>>, vector<1x128xf32>
    %27 = vector.broadcast %26 : vector<1x128xf32> to vector<8x128xf32>
    %28 = arith.addf %25, %27 : vector<8x128xf32>
    %cst_23 = arith.constant 0.000000e+00 : f32
    %29 = vector.broadcast %cst_23 : f32 to vector<8x128xf32>
    %30 = arith.maximumf %28, %29 : vector<8x128xf32>
    %c1_i32 = arith.constant 1 : i32
    %31 = arith.muli %arg0, %c1_i32 : i32
    %32 = arith.addi %31, %arg1 : i32
    %c8_i32 = arith.constant 8 : i32
    %33 = arith.muli %32, %c8_i32 : i32
    %34 = tpu.iota {dimensions = array<i32: 0>} : vector<8x1xi32>
    %35 = vector.broadcast %33 : i32 to vector<8x1xi32>
    %36 = arith.addi %35, %34 : vector<8x1xi32>
    %c0_24 = arith.constant 0 : index
    %37 = memref.load %arg2[%c0_24] : memref<3xi32, #tpu.memory_space<smem>>
    %c1 = arith.constant 1 : index
    %38 = memref.load %arg2[%c1] : memref<3xi32, #tpu.memory_space<smem>>
    %39 = vector.broadcast %37 : i32 to vector<8x1xi32>
    %40 = arith.cmpi sge, %36, %39 : vector<8x1xi32>
    %41 = vector.broadcast %38 : i32 to vector<8x1xi32>
    %42 = arith.cmpi slt, %36, %41 : vector<8x1xi32>
    %43 = arith.andi %40, %42 : vector<8x1xi1>
    %cst_25 = arith.constant 0xFF800000 : f32
    %44 = vector.shape_cast %43 : vector<8x1xi1> to vector<8x1xi1>
    %45 = vector.broadcast %44 : vector<8x1xi1> to vector<8x128xi1>
    %46 = vector.broadcast %cst_25 : f32 to vector<8x128xf32>
    %47 = arith.select %45, %30, %46 : vector<8x128xi1>, vector<8x128xf32>
    %cst_26 = arith.constant dense<0xFF800000> : vector<128xf32>
    %48 = vector.multi_reduction <maximumf>, %47, %cst_26 [0] : vector<8x128xf32> to vector<128xf32>
    %49 = vector.shape_cast %48 : vector<128xf32> to vector<1x128xf32>
    %c1_27 = arith.constant 1 : index
    %50 = memref.load %arg2[%c1_27] : memref<3xi32, #tpu.memory_space<smem>>
    %c2 = arith.constant 2 : index
    %51 = memref.load %arg2[%c2] : memref<3xi32, #tpu.memory_space<smem>>
    %52 = vector.broadcast %50 : i32 to vector<8x1xi32>
    %53 = arith.cmpi sge, %36, %52 : vector<8x1xi32>
    %54 = vector.broadcast %51 : i32 to vector<8x1xi32>
    %55 = arith.cmpi slt, %36, %54 : vector<8x1xi32>
    %56 = arith.andi %53, %55 : vector<8x1xi1>
    %cst_28 = arith.constant 0xFF800000 : f32
    %57 = vector.shape_cast %56 : vector<8x1xi1> to vector<8x1xi1>
    %58 = vector.broadcast %57 : vector<8x1xi1> to vector<8x128xi1>
    %59 = vector.broadcast %cst_28 : f32 to vector<8x128xf32>
    %60 = arith.select %58, %30, %59 : vector<8x128xi1>, vector<8x128xf32>
    %cst_29 = arith.constant dense<0xFF800000> : vector<128xf32>
    %61 = vector.multi_reduction <maximumf>, %60, %cst_29 [0] : vector<8x128xf32> to vector<128xf32>
    %62 = vector.shape_cast %61 : vector<128xf32> to vector<1x128xf32>
    %63 = tpu.concatenate %49, %62 in 0 : vector<1x128xf32>, vector<1x128xf32> -> vector<2x128xf32>
    %64 = vector.shape_cast %63 : vector<2x128xf32> to vector<1x2x128xf32>
    %c0_30 = arith.constant 0 : index
    %c0_31 = arith.constant 0 : index
    %c0_32 = arith.constant 0 : index
    %65 = vector.load %arg12[%c0_30, %c0_31, %c0_32] : memref<1x2x128xf32, #tpu.memory_space<vmem>>, vector<1x2x128xf32>
    %66 = arith.maximumf %65, %64 : vector<1x2x128xf32>
    %c0_33 = arith.constant 0 : index
    %c0_34 = arith.constant 0 : index
    %c0_35 = arith.constant 0 : index
    %67 = vector.load %arg12[%c0_33, %c0_34, %c0_35] : memref<1x2x128xf32, #tpu.memory_space<vmem>>, vector<1x2x128xf32>
    tpu.vector_store %arg12[%c0_33, %c0_34, %c0_35], %66 {strides = array<i32>} : memref<1x2x128xf32, #tpu.memory_space<vmem>>, vector<1x2x128xf32>,
    return
  }
  func.func @transform_0(%arg0: i32, %arg1: i32, %arg2: memref<3xi32, #tpu.memory_space<smem>>) -> (i32, i32) {
    %c1_i32 = arith.constant 1 : i32
    %0 = arith.muli %arg0, %c1_i32 : i32
    %1 = arith.addi %0, %arg1 : i32
    %c0_i32 = arith.constant 0 : i32
    %c0_i32_0 = arith.constant 0 : i32
    return %1, %c0_i32 : i32, i32
  }
  func.func @transform_1(%arg0: i32, %arg1: i32, %arg2: memref<3xi32, #tpu.memory_space<smem>>) -> (i32, i32) {
    %c1_i32 = arith.constant 1 : i32
    %0 = arith.muli %arg0, %c1_i32 : i32
    %1 = arith.addi %0, %arg1 : i32
    %c0_i32 = arith.constant 0 : i32
    %c0_i32_0 = arith.constant 0 : i32
    return %1, %c0_i32 : i32, i32
  }
  func.func @transform_2(%arg0: i32, %arg1: i32, %arg2: memref<3xi32, #tpu.memory_space<smem>>) -> (i32, i32) {
    %c0_i32 = arith.constant 0 : i32
    %c0_i32_0 = arith.constant 0 : i32
    %c0_i32_1 = arith.constant 0 : i32
    return %c0_i32, %c0_i32_0 : i32, i32
  }
  func.func @transform_3(%arg0: i32, %arg1: i32, %arg2: memref<3xi32, #tpu.memory_space<smem>>) -> (i32, i32) {
    %c0_i32 = arith.constant 0 : i32
    %c0_i32_0 = arith.constant 0 : i32
    %c0_i32_1 = arith.constant 0 : i32
    return %c0_i32, %c0_i32_0 : i32, i32
  }
  func.func @transform_4(%arg0: i32, %arg1: i32, %arg2: memref<3xi32, #tpu.memory_space<smem>>) -> (i32, i32) {
    %c0_i32 = arith.constant 0 : i32
    %c0_i32_0 = arith.constant 0 : i32
    %c0_i32_1 = arith.constant 0 : i32
    return %c0_i32, %c0_i32_0 : i32, i32
  }
  func.func @transform_5(%arg0: i32, %arg1: i32, %arg2: memref<3xi32, #tpu.memory_space<smem>>) -> (i32, i32) {
    %c0_i32 = arith.constant 0 : i32
    %c0_i32_0 = arith.constant 0 : i32
    %c0_i32_1 = arith.constant 0 : i32
    return %c0_i32, %c0_i32_0 : i32, i32
  }
  func.func @transform_6(%arg0: i32, %arg1: i32, %arg2: memref<3xi32, #tpu.memory_space<smem>>) -> (i32, i32) {
    %c0_i32 = arith.constant 0 : i32
    %c0_i32_0 = arith.constant 0 : i32
    %c0_i32_1 = arith.constant 0 : i32
    return %c0_i32, %c0_i32_0 : i32, i32
  }
  func.func @transform_7(%arg0: i32, %arg1: i32, %arg2: memref<3xi32, #tpu.memory_space<smem>>) -> (i32, i32) {
    %c0_i32 = arith.constant 0 : i32
    %c0_i32_0 = arith.constant 0 : i32
    %c0_i32_1 = arith.constant 0 : i32
    return %c0_i32, %c0_i32_0 : i32, i32
  }
  func.func @transform_8(%arg0: i32, %arg1: i32, %arg2: memref<3xi32, #tpu.memory_space<smem>>) -> (i32, i32) {
    %c0_i32 = arith.constant 0 : i32
    %c0_i32_0 = arith.constant 0 : i32
    %c0_i32_1 = arith.constant 0 : i32
    return %c0_i32, %c0_i32_0 : i32, i32
  }
  func.func @transform_9(%arg0: i32, %arg1: i32, %arg2: memref<3xi32, #tpu.memory_space<smem>>) -> (i32, i32, i32) {
    %c0_i32 = arith.constant 0 : i32
    %c0_i32_0 = arith.constant 0 : i32
    %c0_i32_1 = arith.constant 0 : i32
    return %arg0, %c0_i32, %c0_i32_0 : i32, i32, i32
  }
}

</mosaic_0001>

<bundles_post_ra>
// kernel: tpu_custom_call.1
= control target key start
LH: loop header
LB: loop body
LE: loop exit
PB: predicated region body
PF: predicated region fallthrough
CT: control target
= control target key end

     0   :  { %s1589_s0 = inlined_call_operand.vmem [shape: s32[3], index: 0, kind: input, shape index: {}]   ;;  %s1590_s1 = inlined_call_operand.vmem [shape: bf16[16,4], index: 1, kind: input, shape index: {}]   ;;  %s1591_s2 = inlined_call_operand.vmem [shape: bf16[16,3], index: 2, kind: input, shape index: {}]   ;;  %s1592_s3 = inlined_call_operand.vmem [shape: bf16[4,128], index: 3, kind: input, shape index: {}]   ;;  %s1593_s4 = inlined_call_operand.vmem [shape: bf16[3,128], index: 4, kind: input, shape index: {}]   ;;  %s1594_s5 = inlined_call_operand.vmem [shape: f32[1,128], index: 5, kind: input, shape index: {}]   ;;  %s1595_s6 = inlined_call_operand.hbm [shape: bf16[128,128], index: 6, kind: input, shape index: {}]   ;;  %s1596_s7 = inlined_call_operand.vmem [shape: f32[1,128], index: 7, kind: input, shape index: {}]   ;;  %s1597_s8 = inlined_call_operand.hbm [shape: bf16[128,128], index: 8, kind: input, shape index: {}]   ;;  %s1598_s9 = inlined_call_operand.vmem [shape: f32[1,128], index: 9, kind: input, shape index: {}]   ;;  %s1599_s10 = inlined_call_operand.hbm [shape: f32[2,2,128], index: 10, kind: output, shape index: {}]  }
   0x1   :  { %s15_s15 = sshll.u32 %s1589_s0, 4  ;;  %s16_s15 = int_to_ptr.vmem [resolvable:$true] %s15_s15 }
   0x2   :  { %s1119_s16 = scalar_lea.vmem %s16_s15, 16  ;;  %p1124_p1 = scmp.lt.s32.totalorder %s16_s15, %s16_s15 }
   0x3   :  { %p1120_p0 = scmp.ne.s32.totalorder %s16_s15, %s1119_s16  ;;  %p1125_p2 = scmp.lt.s32.totalorder %s1119_s16, %s1119_s16 }
   0x5   :  { %p1126_p3 = por %p1125_p2, %p1124_p1 }
   0x7   :  { %p1127_p4 = pnand %p1126_p3, %p1120_p0 }
   0x9   :  { %1130 = shalt.err (!%p1127_p4)  }
   0xa   :  { %s1277_s17 = smov [#allocation3]  }
   0xb   :  { %18 = dma.vmem_to_smem %s16_s15, 16, %s1277_s17, [#allocation2] }
   0xc   :  { %1239 = dma.done.wait [#allocation2], 16 }
   0xd   :  { %1240 = vsyncadd [#allocation2], 4294967280 }
   0xe   :  { %20 = sfence }
   0xf   :  { %21 = vsyncpa [#allocation5], 0 }
  0x10   :  { %22 = vsyncpa [#allocation8], 0 }
  0x11   :  { %23 = vsyncpa [#allocation6], 0 }
  0x12   :  { %25 = vsyncpa [#allocation6 + $0x1], 0  ;;  %s1345_s18 = smov 0   ;;  %s1347_s0 = smov 0  }
  0x13   :  { %s1349_s19 = smov 0   ;;  %s1351_s20 = smov 0  }
  0x14   :  { %s1353_s21 = smov 0   ;;  %s1355_s22 = smov 0  }
  0x15 LB: > { %1608 = sst [smem:[#allocation14_spill]] %s1263_s19  ;;  %s906_s23 = sadd.s32 4294967295, %s1275_s22   ;;  %s1275_s22 = sphi %s1355_s22, %s31_s22   ;;  %s1271_s21 = sphi %s1353_s21, %s1626_s21   ;;  %s1267_s20 = sphi %s1351_s20, %s1625_s20   ;;  %s1263_s19 = sphi %s1349_s19, %s1624_s19   ;;  %s1259_s0 = sphi %s1347_s0, %s1628_s0   ;;  %s1255_s18 = sphi %s1345_s18, %s1627_s18  }
  0x16   : > { %1609 = sst [smem:[#allocation15_spill]] %s1271_s21  ;;  %s907_s24 = sadd.s32 4294967294, %s1275_s22  }
  0x17   : > { %s43_s25 = sadd.s32 1, %s1271_s21  ;;  %s253_s26 = sadd.s32 1, %s1263_s19 }
  0x18   : > { %p45_p5 = scmp.ge.s32.totalorder %s43_s25, 2  ;;  %p263_p6 = scmp.ne.s32.totalorder %s1263_s19, %s1259_s0 }
  0x19   : > { %p264_p7 = scmp.eq.s32.totalorder %s906_s23, 1  ;;  %p269_p8 = scmp.ne.s32.totalorder %s1259_s0, %s1255_s18 }
  0x1a   : > { %s1630_s25 = smov (%p45_p5, %s43_s25), 0  ;;  %p270_p10 = scmp.eq.s32.totalorder %s907_s24, 1 }
  0x1b   : > { %1610 = sst [smem:[#allocation16_spill]] %s1630_s25  ;;  %p1385_p9 = por %p264_p7, %p263_p6 }
  0x1c   : > { %s250_s28 = ssub.s32 %s1271_s21, %s1630_s25  ;;  %p908_p11 = scmp.ge.s32.totalorder %s1275_s22, 1 }
  0x1d   : > { %s1611_s27 = scalar_select %p1385_p9, 1, 0 }
  0x1e   : > { %p251_p12 = scmp.eq.s32.totalorder %s250_s28, 0  ;;  %p1392_p13 = por %p270_p10, %p269_p8 }
  0x1f   : > { %p277_p0 = scmp.lt.s32.totalorder %s1275_s22, 3  ;;  %p1404_p2 = scmp.eq.s32.totalorder %s906_s23, 0 }
  0x20   : > { %s1612_s29 = scalar_select %p1392_p13, 1, 0 }
  0x21   : > { %s1398_s30 = scalar_select %p251_p12, %s1263_s19, %s253_s26  }
  0x22   : > { %1613 = sst [smem:[#allocation17_spill]] %s1612_s29  ;;  %p1400_p1 = pnand %p908_p11, %p277_p0 }
  0x23   : > { %1614 = sst [smem:[#allocation18_spill]] %s1398_s30  ;;  %s1278_s13 = smov [#allocation4]  }
  0x24   : > { %s1615_s11 = scalar_select %p1400_p1, 1, 0 }
  0x25   : > { %s1616_s12 = scalar_select %p1404_p2, 1, 0 }
  0x26   : > { %p1030_p3 = pneg %p1400_p1  ;;  %s298_s14 = sshll.u32 %s1278_s13, 4  ;;  %s299_s14 = int_to_ptr.vmem [resolvable:$true] %s298_s14 }
  0x27   : > { %s1279_s16 = smov [#allocation7]   ;;  %s1131_s26 = scalar_lea.hbm %s1595_s6, 1024 }
  0x28   : > { %p1412_p4 = pnand %p1404_p2, %p1030_p3  ;;  %s314_s17 = sshll.u32 %s1279_s16, 4  ;;  %s1416_s17 = int_to_ptr.vmem [resolvable:$true] %s314_s17 }
  0x29   : > { %p1132_p5 = scmp.ne.s32.totalorder %s1595_s6, %s1131_s26  ;;  %p1138_p10 = scmp.lt.u32.totalorder %s1131_s26, %s1595_s6 }
  0x2a   : > { %p1133_p6 = pneg %p1412_p4 }
  0x2c   : > { %p1134_p7 = pnand %p1133_p6, %p1132_p5 }
  0x2e   : > { %p1135_p8 = pneg %p1134_p7 }
  0x30   : > { %p1140_p11 = pnand %p1138_p10, %p1135_p8 }
  0x32   : > { %1143 = shalt.err (!%p1140_p11)
}
  0x33   : > { %s1144_s16 = scalar_lea.vmem %s299_s14, 1024  ;;  %p1152_p13 = scmp.lt.s32.totalorder %s299_s14, %s299_s14 }
  0x34   : > { %p1145_p12 = scmp.ne.s32.totalorder %s299_s14, %s1144_s16  ;;  %p1153_p9 = scmp.lt.s32.totalorder %s1144_s16, %s1144_s16 }
  0x36   : > { %p1147_p0 = pnand %p1145_p12, %p1133_p6  ;;  %p1154_p2 = por %p1153_p9, %p1152_p13 }
  0x38   : > { %p1148_p3 = pneg %p1147_p0 }
  0x3a   : > { %p1155_p1 = pnand %p1154_p2, %p1148_p3 }
  0x3c   : > { %1158 = shalt.err (!%p1155_p1)
}
  0x3d   : > { %s1280_s25 = smov 64   ;;  %s1281_s23 = smov 4  }
  0x3e   : > { %1033 = dma.hbm_to_vmem [thread:$0]  (!%p1412_p4), %s1595_s6, 1024, %s299_s14, [#allocation5], %s1280_s25, %s1280_s25, %s1281_s23  }
  0x3f   : > { %s1159_s13 = scalar_lea.hbm %s1597_s8, 1024 }
  0x40   : > { %p1160_p5 = scmp.ne.s32.totalorder %s1597_s8, %s1159_s13  ;;  %p1166_p1 = scmp.lt.u32.totalorder %s1159_s13, %s1597_s8 }
  0x42   : > { %p1162_p9 = pnand %p1160_p5, %p1133_p6 }
  0x44   : > { %p1163_p13 = pneg %p1162_p9 }
  0x46   : > { %p1168_p2 = pnand %p1166_p1, %p1163_p13 }
  0x48   : > { %1171 = shalt.err (!%p1168_p2)
}
  0x49   : > { %s1172_s14 = scalar_lea.vmem %s1416_s17, 1024  ;;  %p1180_p11 = scmp.lt.s32.totalorder %s1416_s17, %s1416_s17 }
  0x4a   : > { %p1173_p7 = scmp.ne.s32.totalorder %s1416_s17, %s1172_s14  ;;  %p1181_p12 = scmp.lt.s32.totalorder %s1172_s14, %s1172_s14 }
  0x4c   : > { %p1175_p8 = pnand %p1173_p7, %p1133_p6  ;;  %p1182_p0 = por %p1181_p12, %p1180_p11 }
  0x4e   : > { %p1176_p10 = pneg %p1175_p8 }
  0x50   : > { %p1183_p3 = pnand %p1182_p0, %p1176_p10 }
  0x52   : > { %1186 = shalt.err (!%p1183_p3)
}
  0x53   : > { %1036 = dma.hbm_to_vmem [thread:$0]  (!%p1412_p4), %s1597_s8, 1024, %s1416_s17, [#allocation8], %s1280_s25, %s1280_s25, %s1281_s23  }
  0x54   : > { %p1618_p5 = scmp.ne.s32.totalorder %s1615_s11, 0 }
  0x55   : > { %p1619_p9 = scmp.ne.s32.totalorder (!%p1618_p5), %s1616_s12, 0 }
  0x56   : > { %351 = sbr.rel (%p1618_p5) target bundleno = 789 (0x315), region = 56 }
  0x5d   : > { %1242 = dma.done.wait (%p1619_p9), [#allocation5], 1024  }
  0x5e   : > { %1244 = vsyncadd (%p1619_p9), [#allocation5], 4294966272 }
  0x5f   : > { %1246 = dma.done.wait (%p1619_p9), [#allocation8], 1024  }
  0x60   : > { %1248 = vsyncadd (%p1619_p9), [#allocation8], 4294966272  ;;  %vm422_vm0 = vcmask 1040384   ;;  %v1282_v0 = vmov 0.0   ;;  %p397_p4 = scmp.lt.s32.totalorder %s1267_s20, 1  ;;  %vm423_vm1 = vcmask 1041408   ;;  %v753_v48 = vlaneseq }
  0x61   : > { %974 = vmatprep.subr.bf16.mxu1 %v1282_v0  ;;  %968 = vmatprep.subr.bf16.mxu0 %v1282_v0  ;;  %v1283_v1 = vmov 65535   ;;  %vm1284_vm2 = vmmov 0   ;;  %v415_v4 = vld [vmem:[%s1592_s3] sm:$0x3]  ;;  %vm469_vm3 = vcmask 31744   ;;  %vm418_vm4 = vcmask 23552  }
  0x62   : > { %v424_v2 = vsel %vm422_vm0, 4294967295, %v1283_v1  ;;  %976 = vmatprep.mubr.msk.bf16.mxu1 %vm1284_vm2, %v1282_v0  ;;  %970 = vmatprep.mubr.msk.bf16.mxu0 %vm1284_vm2, %v1282_v0  ;;  %s398_s30 = scalar_select %p397_p4, %s1267_s20, 1  ;;  %v417_v5 = vld [vmem:[%s1593_s4] sm:$0x3]  ;;  %v474_v7 = vsel %vm423_vm1, %v415_v4, 0  ;;  %v1104_v11 = vld [vmem:[#allocation4 + $0x8] sm:$0xff]  }
  0x63   : > { %v425_v3 = vsel %vm423_vm1, %v424_v2, 0  ;;  %975 = vmatpush3.bf16.msra.mxu1 %v474_v7  ;;  %v1103_v10 = vld [vmem:[#allocation4] sm:$0xff]   ;;  %v1105_v12 = vld [vmem:[#allocation4 + $0x10] sm:$0xff]   ;;  %v1106_v13 = vld [vmem:[#allocation4 + $0x18] sm:$0xff]   ;;  %v1285_v47 = vmov -inf   ;;  %s757_s15 = sld [smem:[#allocation3]] }
  0x64   : > { %s916_s11 = sshll.u32 %s398_s30, 2  ;;  %v427_v8 = vand.u32 %v425_v3, %v417_v5  ;;  %1000 = vmatprep.subr.bf16.mxu1 %v1282_v0  ;;  %v1107_v14 = vld [vmem:[#allocation4 + $0x20] sm:$0xff]   ;;  %v1108_v15 = vld [vmem:[#allocation4 + $0x28] sm:$0xff]   ;;  %v1109_v16 = vld [vmem:[#allocation4 + $0x30] sm:$0xff]   ;;  %s393_s30 = sand.u32 1, %s1259_s0   ;;  %v754_v49 = vshrl.u32 %v753_v48, 7 }
  0x65   : > { %s400_s17 = scalar_lea.vmem %s1590_s1, %s916_s11  ;;  %s406_s21 = scalar_lea.vmem %s1591_s2, %s916_s11  ;;  %v1110_v17 = vld [vmem:[#allocation4 + $0x38] sm:$0xff]   ;;  %v1111_v18 = vld [vmem:[#allocation7] sm:$0xff]   ;;  %v1112_v19 = vld [vmem:[#allocation7 + $0x8] sm:$0xff]  }
  0x66   : > { %v414_v6 = vld [vmem:[%s400_s17] sm:$0xf]  ;;  %969 = vmatpush3.bf16.msra.mxu0 %v427_v8  ;;  %v1113_v20 = vld [vmem:[#allocation7 + $0x10] sm:$0xff]   ;;  %v1114_v21 = vld [vmem:[#allocation7 + $0x18] sm:$0xff]   ;;  %s915_s11 = sshll.u32 %s393_s30, 1  ;;  %s940_s17 = sld [smem:[#allocation3 + $0x1]] }
  0x67   : > { %v416_v9 = vld [vmem:[%s406_s21] sm:$0xf]  ;;  %980 = vmatprep.subr.bf16.mxu0 %v1282_v0  ;;  %977 = vmatmul.mubr.msk.bf16.vlgmr.msra.gmra.mrb[0].mxu1 %vm469_vm3, %v414_v6  ;;  %v1116_v23 = vld [vmem:[#allocation7 + $0x28] sm:$0xff]   ;;  %v1117_v37 = vld [vmem:[#allocation7 + $0x30] sm:$0xff]   ;;  %s1525_s12 = scalar_lea.vmem [#allocation9], %s915_s11  ;;  %s939_s25 = sshll.u32 %s1267_s20, 3 }
  0x68   : > { %1016 = vmatprep.mubr.msk.bf16.mxu1 %vm1284_vm2, %v1282_v0  ;;  %1001 = vmatpush3.bf16.msra.mxu1 %v1111_v18  ;;  %v1115_v22 = vld [vmem:[#allocation7 + $0x20] sm:$0xff]   ;;  %v1118_v38 = vld [vmem:[#allocation7 + $0x38] sm:$0xff]   ;;  %413 = vst [vmem:[%s1525_s12] sm:$0x3] %v1285_v47  ;;  %s941_s23 = sld [smem:[#allocation3 + $0x2]]  ;;  %v755_v50 = vstv %s939_s25  ;;  %s943_s26 = sshll.u32 %s1267_s20, 5 }
  0x69   : > { %971 = vmatmul.mubr.msk.bf16.vlgmr.msra.gmra.mrb[0].mxu0 %vm418_vm4, %v416_v9  ;;  %1002 = vmatprep.subr.bf16.mxu1 %v1282_v0  ;;  %v920_v26 = vld [vmem:[%s1594_s5] ss:$0 sm:$0xff]  ;;  %v756_v51 = vadd.s32 %v755_v50, %v754_v49  ;;  %v759_v52 = vstv %s757_s15  ;;  %s805_s28 = sshll.u32 %s1525_s12, 4  ;;  %s1539_s14 = scalar_lea.hbm %s1599_s10, %s943_s26  ;;  %s1541_s28 = int_to_ptr.vmem [resolvable:$true] %s805_s28 }
  0x6a   : > { %981 = vmatpush3.bf16.msra.mxu0 %v1103_v10  ;;  %996 = vmatprep.mubr.msk.bf16.mxu0 %vm1284_vm2, %v1282_v0  ;;  %v921_v39 = vld [vmem:[%s1596_s7] ss:$0 sm:$0xff]  ;;  %s792_s19 = scalar_lea.sflag [#allocation6], %s393_s30  ;;  %s1187_s29 = scalar_lea.vmem %s1541_s28, 32 }
  0x6b   : > { %982 = vmatprep.subr.bf16.mxu0 %v1282_v0  ;;  %v930_v55 = vld [vmem:[%s1598_s9] ss:$0 sm:$0xff]  ;;  %vm760_vm5 = vcmp.ge.s32.totalorder %v756_v51, %v759_v52  ;;  %p1188_p6 = scmp.ne.s32.totalorder %s1541_s28, %s1187_s29  ;;  %p1620_p13 = scmp.ne.s32.totalorder %s1611_s27, 0 }
  0x6c   : > { %1003 = vmatpush3.bf16.msra.mxu1 %v1112_v19  ;;  %v761_v53 = vstv %s940_s17  ;;  %s1286_s20 = smov [#allocation9]  }
  0x6d   : > { %1004 = vmatprep.subr.bf16.mxu1 %v1282_v0  ;;  %vm762_vm6 = vcmp.lt.s32.totalorder %v756_v51, %v761_v53  ;;  %vm774_vm7 = vcmp.ge.s32.totalorder %v756_v51, %v761_v53  ;;  %p1189_p1 = pnand %p1188_p6, %p1620_p13  ;;  %s1191_s11 = sshll.u32 %s1286_s20, 4  ;;  %s1192_s11 = int_to_ptr.vmem [resolvable:$false] %s1191_s11 }
  0x6e   : > { %983 = vmatpush3.bf16.msra.mxu0 %v1104_v11  ;;  %v775_v54 = vstv %s941_s23  ;;  %vm763_vm9 = vmand %vm760_vm5, %vm762_vm6  ;;  %s1193_s15 = scalar_lea.vmem %s1192_s11, 64  ;;  %p1194_p7 = scmp.lt.s32.totalorder %s1541_s28, %s1192_s11 }
  0x6f   : > { %984 = vmatprep.subr.bf16.mxu0 %v1282_v0  ;;  %vm776_vm8 = vcmp.lt.s32.totalorder %v756_v51, %v775_v54  ;;  %p1190_p2 = pneg %p1189_p1  ;;  %p1195_p8 = scmp.lt.s32.totalorder %s1193_s15, %s1187_s29 }
  0x70   : > { %1005 = vmatpush3.bf16.msra.mxu1 %v1113_v20  ;;  %vm777_vm10 = vmand %vm774_vm7, %vm776_vm8 }
  0x71   : > { %1006 = vmatprep.subr.bf16.mxu1 %v1282_v0  ;;  %p1196_p10 = por %p1195_p8, %p1194_p7 }
  0x72   : > { %985 = vmatpush3.bf16.msra.mxu0 %v1105_v12  ;;  %v788_v12 = vld [vmem:[%s1525_s12] sm:$0x3] }
  0x73   : > { %986 = vmatprep.subr.bf16.mxu0 %v1282_v0  ;;  %p1197_p11 = pnand %p1196_p10, %p1190_p2 }
  0x74   : > { %1007 = vmatpush3.bf16.msra.mxu1 %v1114_v21 }
  0x75   : > { %1008 = vmatprep.subr.bf16.mxu1 %v1282_v0 }
  0x76   : > { %987 = vmatpush3.bf16.msra.mxu0 %v1106_v13 }
  0x77   : > { %988 = vmatprep.subr.bf16.mxu0 %v1282_v0 }
  0x78   : > { %1009 = vmatpush3.bf16.msra.mxu1 %v1115_v22 }
  0x79   : > { %1010 = vmatprep.subr.bf16.mxu1 %v1282_v0 }
  0x7a   : > { %989 = vmatpush3.bf16.msra.mxu0 %v1107_v14 }
  0x7b   : > { %990 = vmatprep.subr.bf16.mxu0 %v1282_v0 }
  0x7c   : > { %1011 = vmatpush3.bf16.msra.mxu1 %v1116_v23 }
  0x7d   : > { %1012 = vmatprep.subr.bf16.mxu1 %v1282_v0 }
  0x7e   : > { %991 = vmatpush3.bf16.msra.mxu0 %v1108_v15 }
  0x7f   : > { %992 = vmatprep.subr.bf16.mxu0 %v1282_v0 }
  0x80   : > { %1013 = vmatpush3.bf16.msra.mxu1 %v1117_v37 }
  0x81   : > { %1014 = vmatprep.subr.bf16.mxu1 %v1282_v0 }
  0x82   : > { %993 = vmatpush3.bf16.msra.mxu0 %v1109_v16 }
  0x83   : > { %994 = vmatprep.subr.bf16.mxu0 %v1282_v0 }
  0x84   : > { %1015 = vmatpush3.bf16.msra.mxu1 %v1118_v38 }
  0x86   : > { %995 = vmatpush3.bf16.msra.mxu0 %v1110_v17 }
 0x13a   : > { %v510_v24 = vpop.f32.mrb[0].mxu1 }
 0x13b   : > { %v978_v27 = vpop.f32.mrb[1].mxu1 }
 0x13c   : > { %v463_v25 = vpop.f32.mrb[0].mxu0  ;;  %v513_v30 = vpop.f32.mrb[2].mxu1 }
 0x13d   : > { %v511_v28 = vadd.f32 %v510_v24, %v463_v25  ;;  %v972_v29 = vpop.f32.mrb[1].mxu0  ;;  %v979_v32 = vpop.f32.mrb[3].mxu1 }
 0x13e   : > { %v466_v31 = vpop.f32.mrb[2].mxu0 }
 0x13f   : > { %v523_v33 = vadd.f32 %v920_v26, %v511_v28  ;;  %v973_v34 = vpop.f32.mrb[3].mxu0 }
 0x141   : > { %v524_v35 = vmax.f32 %v523_v33, 0.0 }
 0x143   : > { %v525_v36 = vpack.c.bf16 %v524_v35, %v524_v35 }
 0x145   : > { %997 = vmatmul.mubr.bf16.vlgmr.msra.gmra.mrb[4].mxu0 %v525_v36 }
 0x218   : > { %v631_v40 = vpop.f32.mrb[4].mxu0 }
 0x219   : > { %v632_v41 = vadd.f32 %v921_v39, %v631_v40  ;;  %v998_v42 = vpop.f32.mrb[5].mxu0 }
 0x21a   : > { %v634_v43 = vpop.f32.mrb[6].mxu0 }
 0x21b   : > { %v637_v44 = vmax.f32 %v632_v41, 0.0  ;;  %v999_v45 = vpop.f32.mrb[7].mxu0 }
 0x21d   : > { %v638_v46 = vpack.c.bf16 %v637_v44, %v637_v44 }
 0x21f   : > { %1017 = vmatmul.mubr.bf16.vlgmr.msra.gmra.mrb[4].mxu1 %v638_v46 }
 0x2f2   : > { %v744_v56 = vpop.f32.mrb[4].mxu1 }
 0x2f3   : > { %v745_v57 = vadd.f32 %v930_v55, %v744_v56  ;;  %v1018_v58 = vpop.f32.mrb[5].mxu1 }
 0x2f4   : > { %v747_v59 = vpop.f32.mrb[6].mxu1 }
 0x2f5   : > { %v750_v60 = vmax.f32 %v745_v57, 0.0  ;;  %v1019_v61 = vpop.f32.mrb[7].mxu1 }
 0x2f7   : > { %v766_v62 = vsel %vm763_vm9, %v750_v60, -inf  ;;  %v780_v63 = vsel %vm777_vm10, %v750_v60, -inf }
 0x2f8   : > { %v767_v0 = vrot.slane %v766_v62, 4  ;;  %v781_v1 = vrot.slane %v780_v63, 4 }
 0x2fa   : > { %v768_v2 = vmax.f32 %v766_v62, %v767_v0  ;;  %v782_v3 = vmax.f32 %v780_v63, %v781_v1 }
 0x2fc   : > { %v769_v4 = vrot.slane %v768_v2, 2  ;;  %v783_v5 = vrot.slane %v782_v3, 2 }
 0x2fe   : > { %v770_v6 = vmax.f32 %v768_v2, %v769_v4  ;;  %v784_v7 = vmax.f32 %v782_v3, %v783_v5 }
 0x300   : > { %v771_v8 = vrot.slane %v770_v6, 1  ;;  %v785_v9 = vrot.slane %v784_v7, 1 }
 0x302   : > { %v772_v10 = vmax.f32 %v770_v6, %v771_v8  ;;  %v786_v11 = vmax.f32 %v784_v7, %v785_v9 }
 0x304   : > { %v787_v13 = vsel %vm422_vm0, %v772_v10, %v786_v11 }
 0x305   : > { %v789_v14 = vmax.f32 %v788_v12, %v787_v13 }
 0x307   : > { %790 = vst [vmem:[%s1525_s12] sm:$0x3] %v789_v14 }
 0x308   : > { %1200 = shalt.err (!%p1197_p11)
}
 0x309   : > { %s1201_s30 = scalar_lea.hbm %s1539_s14, 32  ;;  %s1205_s25 = scalar_lea.hbm %s1599_s10, 64 }
 0x30a   : > { %p1202_p12 = scmp.ne.s32.totalorder %s1539_s14, %s1201_s30  ;;  %p1206_p5 = scmp.lt.u32.totalorder %s1539_s14, %s1599_s10 }
 0x30b   : > { %p1207_p9 = scmp.lt.u32.totalorder %s1205_s25, %s1201_s30  ;;  %p1209_p6 = scmp.lt.u32.totalorder %s1201_s30, %s1539_s14 }
 0x30c   : > { %p1203_p0 = pnand %p1202_p12, %p1620_p13 }
 0x30d   : > { %p1208_p4 = por %p1207_p9, %p1206_p5 }
 0x30e   : > { %p1204_p3 = pneg %p1203_p0 }
 0x30f   : > { %p1210_p1 = por %p1209_p6, %p1208_p4 }
 0x311   : > { %p1211_p2 = pnand %p1210_p1, %p1204_p3 }
 0x313   : > { %1214 = shalt.err (!%p1211_p2)
}
 0x314   : > { %1028 = dma.vmem_to_hbm [thread:$0]  (%p1620_p13), %s1541_s28, 32, %s1539_s14, %s792_s19  }
 0x315 PF: > { %s1621_s24 = sld [smem:[#allocation17_spill]]  ;;  %p1045_p7 = scmp.ge.s32.totalorder %s1275_s22, 2 }
 0x316   : > { %s817_s26 = sand.u32 1, %s1255_s18  }
 0x317   : > { %s818_s13 = scalar_lea.sflag [#allocation6], %s817_s26 }
 0x31b   : > { %p1622_p8 = scmp.ne.s32.totalorder %s1621_s24, 0 }
 0x31d   : > { %p1038_p10 = pnand %p1045_p7, %p1622_p8 }
 0x31f   : > { %1250 = dma.done.wait (!%p1038_p10), %s818_s13, 32  }
 0x320   : > { %1252 = vsyncadd (!%p1038_p10), %s818_s13, 4294967264  ;;  %s31_s22 = sadd.s32 1, %s1275_s22   ;;  %s1623_s16 = sld [smem:[#allocation14_spill]] }
 0x321   : > { %p28_p11 = scmp.ge.s32.totalorder %s31_s22, 4   ;;  %s1624_s19 = sld [smem:[#allocation18_spill]] }
 0x322   : > { %s1625_s20 = sld [smem:[#allocation15_spill]]  ;;  %s1626_s21 = sld [smem:[#allocation16_spill]] }
 0x323   : > { %s1627_s18 = smov %s1259_s0  ;;  %30 = sbr.rel (!%p28_p11) target bundleno = 21 (0x15), region = 107 }
 0x326   : > { %s1628_s0 = smov %s1623_s16 }
 0x32a   :  { %823 = vsyncpa [#allocation5], 1 }
 0x32b   :  { %825 = vsyncpa [#allocation5 + $0x1], 1 }
 0x32c   :  { %826 = vsyncpa [#allocation8], 1 }
 0x32d   :  { %827 = vsyncpa [#allocation6], 1 }
 0x32e   :  { %829 = vsyncpa [#allocation6 + $0x1], 1 }

</bundles_post_ra>
